<compile_context>
chip_gen: v7x
topology: tpu7x:2x2x1
jax: 0.10.0
libtpu: 0.0.40
codegen_flags: <defaults>
</compile_context>

<pallas_src>
import math

import jax
import jax.numpy as jnp
import numpy as np
from jax.experimental import pallas as pl
from jax.experimental.pallas import tpu as pltpu


# ---------------- deterministic "parameter" construction (host-side) --------

def _gaussian_1d(kernel_size: int, sigma: float) -> np.ndarray:
    x = np.arange(kernel_size, dtype=np.float32)
    mean = (kernel_size - 1) / 2.0
    g = np.exp(-((x - mean) ** 2) / (2.0 * sigma ** 2))
    return (g / g.sum()).astype(np.float32)


def _conv_matrix(n: int, g1d: np.ndarray, ka: int) -> np.ndarray:
    """Dense matrix of the zero-padded 1D 'same' conv: (A @ v)[i] = sum_p g[p] v[i+p-ka]."""
    K = g1d.shape[0]
    A = np.zeros((n, n), dtype=np.float32)
    for i in range(n):
        for p in range(K):
            m = i + p - ka
            if 0 <= m < n:
                A[i, m] += g1d[p]
    return A


def _bilinear_matrix(n_in: int, n_out: int) -> np.ndarray:
    """Dense matrix of 1D bilinear resize with align_corners=True (PyTorch semantics)."""
    R = np.zeros((n_out, n_in), dtype=np.float32)
    for i in range(n_out):
        src = 0.0 if n_out == 1 else i * (n_in - 1) / (n_out - 1)
        i0 = int(math.floor(src))
        i1 = min(i0 + 1, n_in - 1)
        f = src - i0
        R[i, i0] += 1.0 - f
        R[i, i1] += f
    return R


def _fused_operators(H: int, W: int, scale: float):
    """Fold blur + bilinear resize into My (Ho,H) and MxT (W,Wo) for one scale."""
    sigma = (1.0 / scale - 1.0) / 2.0
    ks = 2 * round(sigma * 4) + 1          # same Python round() as the torch module
    ka = ks // 2                           # ks is odd -> kb == ka
    g = _gaussian_1d(ks, sigma)
    Ho = int(math.floor(H * scale))
    Wo = int(math.floor(W * scale))
    My = (_bilinear_matrix(H, Ho) @ _conv_matrix(H, g, ka)).astype(np.float32)        # (Ho, H)
    MxT = ((_bilinear_matrix(W, Wo) @ _conv_matrix(W, g, ka)).T).astype(np.float32)   # (W, Wo)
    return My, MxT, Ho, Wo


# ---------------------------- Pallas kernel ---------------------------------

def _make_pyramid_kernel(num_scales: int, Bt: int):
    def kernel(x_ref, *refs):
        # x_ref:            (Bt, H, W)      batch of (n,c)-slices for this step
        # refs[0:2S]:       My_s (Ho_s,H), MxT_s (W,Wo_s)   -- VMEM resident
        # refs[2S:3S]:      out_s (Ho_s, Bt*Wo_s)           -- lane-dense slab
        # refs[3S:4S]:      tmp_s (H,  Bt*Wo_s)             -- VMEM scratch
        op_refs = refs[:2 * num_scales]
        out_refs = refs[2 * num_scales:3 * num_scales]
        tmp_refs = refs[3 * num_scales:]
        for s in range(num_scales):
            my = op_refs[2 * s][...]          # (Ho, H)
            mxT = op_refs[2 * s + 1][...]     # (W, Wo)
            wo = mxT.shape[1]
            tmp = tmp_refs[s]                 # (H, Bt*Wo)
            # Stage 1: W-contraction per image, packed into the lane-dense slab.
            for b in range(Bt):
                t_b = jnp.dot(x_ref[b], mxT,
                              preferred_element_type=jnp.float32)    # (H, Wo)
                tmp[:, b * wo:(b + 1) * wo] = t_b.astype(tmp.dtype)
            # Stage 2: H-contraction as ONE large MXU matmul; unmasked,
            # lane-dense store of the whole output block.
            out_refs[s][...] = jnp.dot(
                my, tmp[...], preferred_element_type=jnp.float32
            ).astype(out_refs[s].dtype)
    return kernel


# ------------------------------ wrapper --------------------------------------

def image_pyramide(x: jax.Array, scales, *, compute_dtype=jnp.float32,
                   vmem_block_budget_bytes=16 * 1024 * 1024,
                   max_batch_per_step=16) -> dict:
    """Pallas equivalent of ImagePyramide(scales, num_channels).forward(x); x is NCHW."""
    N, C, H, W = x.shape
    out_dict = {}
    work = []
    for scale in scales:
        key = 'prediction_' + str(scale).replace('-', '.')
        if float(scale) == 1.0:
            out_dict[key] = x        # torch module returns the input unchanged
        else:
            work.append((key, float(scale)))
    if not work:
        return out_dict

    ops = [_fused_operators(H, W, s) for _, s in work]
    S = len(work)
    B = N * C
    itemsize = np.dtype(compute_dtype).itemsize

    # ---- pick Bt: (n,c)-slices per grid step, from a conservative VMEM budget
    # (double-buffered x + outputs, single-buffered scratch); operators are fixed.
    per_b = itemsize * (2 * H * W
                        + sum(2 * Ho * Wo + H * Wo for _, _, Ho, Wo in ops))
    fixed = itemsize * sum(2 * (Ho * H + W * Wo) for _, _, Ho, Wo in ops)
    bt_cap = max(1, int((vmem_block_budget_bytes - fixed) // max(per_b, 1)))
    Bt = min(bt_cap, max_batch_per_step, B)
    if B > 1:                           # keep >= 2 grid steps so the batch axis
        Bt = min(Bt, -(-B // 2))        # can shard across v7x's two TensorCores
    Bt = max(Bt, 1)
    nb = -(-B // Bt)
    Bp = nb * Bt

    xb = x.reshape(B, H, W).astype(compute_dtype)
    if Bp != B:
        xb = jnp.concatenate([xb, jnp.zeros((Bp - B, H, W), compute_dtype)], axis=0)

    in_specs = [pl.BlockSpec((Bt, H, W), lambda i: (i, 0, 0))]
    op_arrays = []
    out_shapes = []
    out_specs = []
    scratch_shapes = []
    for (My, MxT, Ho, Wo) in ops:
        op_arrays.append(jnp.asarray(My, dtype=compute_dtype))
        op_arrays.append(jnp.asarray(MxT, dtype=compute_dtype))
        in_specs.append(pl.BlockSpec((Ho, H), lambda i: (0, 0)))   # VMEM resident
        in_specs.append(pl.BlockSpec((W, Wo), lambda i: (0, 0)))   # VMEM resident
        out_shapes.append(jax.ShapeDtypeStruct((nb, Ho, Bt * Wo), compute_dtype))
        out_specs.append(pl.BlockSpec((pl.Squeezed(), Ho, Bt * Wo),
                                      lambda i: (i, 0, 0)))
        scratch_shapes.append(pltpu.VMEM((H, Bt * Wo), compute_dtype))

    results = pl.pallas_call(
        _make_pyramid_kernel(S, Bt),
        out_shape=tuple(out_shapes),
        grid_spec=pltpu.PrefetchScalarGridSpec(
            num_scalar_prefetch=0,
            grid=(nb,),
            in_specs=in_specs,
            out_specs=tuple(out_specs),
            scratch_shapes=scratch_shapes,
        ),
        compiler_params=pltpu.CompilerParams(
            dimension_semantics=("parallel",),
            vmem_limit_bytes=40 * 1024 * 1024,   # < v7x's 64 MiB physical VMEM
        ),
    )(xb, *op_arrays)

    if not isinstance(results, (tuple, list)):
        results = (results,)

    for (key, _), (_, _, Ho, Wo), r in zip(work, ops, results):
        # (nb, Ho, Bt*Wo) -> (nb, Ho, Bt, Wo) -> (nb, Bt, Ho, Wo) -> (B, Ho, Wo)
        y = r.reshape(nb, Ho, Bt, Wo).transpose(0, 2, 1, 3).reshape(Bp, Ho, Wo)
        out_dict[key] = y[:B].reshape(N, C, Ho, Wo)
    return out_dict


# ------------------------------- demo ----------------------------------------

if __name__ == "__main__":
    key = jax.random.PRNGKey(0)
    N, C, H, W = 2, 4, 16, 16
    x = jax.random.normal(key, (N, C, H, W), dtype=jnp.float32)

    scales = [1, 0.5, 0.25]
    outs = jax.block_until_ready(image_pyramide(x, scales))

    # correctness: compare against a plain-JAX einsum with the same fused operators
    for scale in scales:
        key_name = 'prediction_' + str(scale)
        y = outs[key_name]
        if float(scale) == 1.0:
            ref = x
        else:
            My, MxT, Ho, Wo = _fused_operators(H, W, float(scale))
            ref = jnp.einsum('oh,nchw,wp->ncop',
                             jnp.asarray(My), x, jnp.asarray(MxT))
        assert y.shape == ref.shape, (key_name, y.shape, ref.shape)
        assert bool(jnp.allclose(y, ref, atol=1e-5, rtol=1e-5)), key_name

    # optional bf16 compute path (halves HBM traffic, f32 MXU accumulation)
    outs_bf16 = jax.block_until_ready(
        image_pyramide(x, [0.5], compute_dtype=jnp.bfloat16))
    My, MxT, Ho, Wo = _fused_operators(H, W, 0.5)
    ref = jnp.einsum('oh,nchw,wp->ncop', jnp.asarray(My), x, jnp.asarray(MxT))
    y16 = outs_bf16['prediction_0.5'].astype(jnp.float32)
    assert bool(jnp.allclose(y16, ref, atol=1e-1, rtol=1e-1))

    print("KERNEL_OK")
</pallas_src>

<mosaic_0001>
module attributes {stable_mosaic.version = 11 : i64} {
  func.func @kernel(%arg0: i32, %arg1: memref<4x16x16xf32, #tpu.memory_space<vmem>>, %arg2: memref<8x16xf32, #tpu.memory_space<vmem>>, %arg3: memref<16x8xf32, #tpu.memory_space<vmem>>, %arg4: memref<4x16xf32, #tpu.memory_space<vmem>>, %arg5: memref<16x4xf32, #tpu.memory_space<vmem>>, %arg6: memref<1x8x32xf32, #tpu.memory_space<vmem>>, %arg7: memref<1x4x16xf32, #tpu.memory_space<vmem>>, %arg8: memref<16x32xf32, #tpu.memory_space<vmem>>, %arg9: memref<16x16xf32, #tpu.memory_space<vmem>>) attributes {dimension_semantics = [#tpu.dimension_semantics<parallel>], iteration_bounds = array<i64: 2>, scalar_prefetch = 0 : i64, scratch_operands = 2 : i64, tpu.core_type = #tpu.core_type<tc>, window_params = [{transform_indices = @transform_0, window_bounds = array<i64: 4, 16, 16>}, {pipeline_mode = #tpu.pipeline_mode<synchronous>, transform_indices = @transform_1, window_bounds = array<i64: 8, 16>}, {pipeline_mode = #tpu.pipeline_mode<synchronous>, transform_indices = @transform_2, window_bounds = array<i64: 16, 8>}, {pipeline_mode = #tpu.pipeline_mode<synchronous>, transform_indices = @transform_3, window_bounds = array<i64: 4, 16>}, {pipeline_mode = #tpu.pipeline_mode<synchronous>, transform_indices = @transform_4, window_bounds = array<i64: 16, 4>}, {transform_indices = @transform_5, window_bounds = array<i64: 1, 8, 32>}, {transform_indices = @transform_6, window_bounds = array<i64: 1, 4, 16>}]} {
    %c0 = arith.constant 0 : index
    %c0_0 = arith.constant 0 : index
    %0 = vector.load %arg2[%c0, %c0_0] : memref<8x16xf32, #tpu.memory_space<vmem>>, vector<8x16xf32>
    %c0_1 = arith.constant 0 : index
    %c0_2 = arith.constant 0 : index
    %1 = vector.load %arg3[%c0_1, %c0_2] : memref<16x8xf32, #tpu.memory_space<vmem>>, vector<16x8xf32>
    %c0_3 = arith.constant 0 : index
    %c0_4 = arith.constant 0 : index
    %c0_5 = arith.constant 0 : index
    %2 = vector.load %arg1[%c0_3, %c0_4, %c0_5] : memref<4x16x16xf32, #tpu.memory_space<vmem>>, vector<1x16x16xf32>
    %3 = vector.shape_cast %2 : vector<1x16x16xf32> to vector<16x16xf32>
    %cst = arith.constant dense<0.000000e+00> : vector<16x8xf32>
    %4 = tpu.matmul %3, %1, %cst {dimension_numbers = #tpu.dot_dimension_numbers<[1], [0], [0], [1], [0, 0, 1, 1], [], []>} : vector<16x16xf32>, vector<16x8xf32>, vector<16x8xf32> -> vector<16x8xf32>
    %c0_6 = arith.constant 0 : index
    %c0_7 = arith.constant 0 : index
    %5 = vector.load %arg8[%c0_6, %c0_7] : memref<16x32xf32, #tpu.memory_space<vmem>>, vector<16x8xf32>
    tpu.vector_store %arg8[%c0_6, %c0_7], %4 {strides = array<i32>} : memref<16x32xf32, #tpu.memory_space<vmem>>, vector<16x8xf32>,
    %c1 = arith.constant 1 : index
    %c0_8 = arith.constant 0 : index
    %c0_9 = arith.constant 0 : index
    %6 = vector.load %arg1[%c1, %c0_8, %c0_9] : memref<4x16x16xf32, #tpu.memory_space<vmem>>, vector<1x16x16xf32>
    %7 = vector.shape_cast %6 : vector<1x16x16xf32> to vector<16x16xf32>
    %cst_10 = arith.constant dense<0.000000e+00> : vector<16x8xf32>
    %8 = tpu.matmul %7, %1, %cst_10 {dimension_numbers = #tpu.dot_dimension_numbers<[1], [0], [0], [1], [0, 0, 1, 1], [], []>} : vector<16x16xf32>, vector<16x8xf32>, vector<16x8xf32> -> vector<16x8xf32>
    %c0_11 = arith.constant 0 : index
    %c8 = arith.constant 8 : index
    %9 = vector.load %arg8[%c0_11, %c8] : memref<16x32xf32, #tpu.memory_space<vmem>>, vector<16x8xf32>
    tpu.vector_store %arg8[%c0_11, %c8], %8 {strides = array<i32>} : memref<16x32xf32, #tpu.memory_space<vmem>>, vector<16x8xf32>,
    %c2 = arith.constant 2 : index
    %c0_12 = arith.constant 0 : index
    %c0_13 = arith.constant 0 : index
    %10 = vector.load %arg1[%c2, %c0_12, %c0_13] : memref<4x16x16xf32, #tpu.memory_space<vmem>>, vector<1x16x16xf32>
    %11 = vector.shape_cast %10 : vector<1x16x16xf32> to vector<16x16xf32>
    %cst_14 = arith.constant dense<0.000000e+00> : vector<16x8xf32>
    %12 = tpu.matmul %11, %1, %cst_14 {dimension_numbers = #tpu.dot_dimension_numbers<[1], [0], [0], [1], [0, 0, 1, 1], [], []>} : vector<16x16xf32>, vector<16x8xf32>, vector<16x8xf32> -> vector<16x8xf32>
    %c0_15 = arith.constant 0 : index
    %c16 = arith.constant 16 : index
    %13 = vector.load %arg8[%c0_15, %c16] : memref<16x32xf32, #tpu.memory_space<vmem>>, vector<16x8xf32>
    tpu.vector_store %arg8[%c0_15, %c16], %12 {strides = array<i32>} : memref<16x32xf32, #tpu.memory_space<vmem>>, vector<16x8xf32>,
    %c3 = arith.constant 3 : index
    %c0_16 = arith.constant 0 : index
    %c0_17 = arith.constant 0 : index
    %14 = vector.load %arg1[%c3, %c0_16, %c0_17] : memref<4x16x16xf32, #tpu.memory_space<vmem>>, vector<1x16x16xf32>
    %15 = vector.shape_cast %14 : vector<1x16x16xf32> to vector<16x16xf32>
    %cst_18 = arith.constant dense<0.000000e+00> : vector<16x8xf32>
    %16 = tpu.matmul %15, %1, %cst_18 {dimension_numbers = #tpu.dot_dimension_numbers<[1], [0], [0], [1], [0, 0, 1, 1], [], []>} : vector<16x16xf32>, vector<16x8xf32>, vector<16x8xf32> -> vector<16x8xf32>
    %c0_19 = arith.constant 0 : index
    %c24 = arith.constant 24 : index
    %17 = vector.load %arg8[%c0_19, %c24] : memref<16x32xf32, #tpu.memory_space<vmem>>, vector<16x8xf32>
    tpu.vector_store %arg8[%c0_19, %c24], %16 {strides = array<i32>} : memref<16x32xf32, #tpu.memory_space<vmem>>, vector<16x8xf32>,
    %c0_20 = arith.constant 0 : index
    %c0_21 = arith.constant 0 : index
    %18 = vector.load %arg8[%c0_20, %c0_21] : memref<16x32xf32, #tpu.memory_space<vmem>>, vector<16x32xf32>
    %cst_22 = arith.constant dense<0.000000e+00> : vector<8x32xf32>
    %19 = tpu.matmul %0, %18, %cst_22 {dimension_numbers = #tpu.dot_dimension_numbers<[1], [0], [0], [1], [0, 0, 1, 1], [], []>} : vector<8x16xf32>, vector<16x32xf32>, vector<8x32xf32> -> vector<8x32xf32>
    %c0_23 = arith.constant 0 : index
    %c0_24 = arith.constant 0 : index
    %c0_25 = arith.constant 0 : index
    %20 = vector.load %arg6[%c0_23, %c0_24, %c0_25] : memref<1x8x32xf32, #tpu.memory_space<vmem>>, vector<1x8x32xf32>
    %21 = vector.shape_cast %20 : vector<1x8x32xf32> to vector<8x32xf32>
    %22 = vector.shape_cast %19 : vector<8x32xf32> to vector<1x8x32xf32>
    tpu.vector_store %arg6[%c0_23, %c0_24, %c0_25], %22 {strides = array<i32>} : memref<1x8x32xf32, #tpu.memory_space<vmem>>, vector<1x8x32xf32>,
    %c0_26 = arith.constant 0 : index
    %c0_27 = arith.constant 0 : index
    %23 = vector.load %arg4[%c0_26, %c0_27] : memref<4x16xf32, #tpu.memory_space<vmem>>, vector<4x16xf32>
    %c0_28 = arith.constant 0 : index
    %c0_29 = arith.constant 0 : index
    %24 = vector.load %arg5[%c0_28, %c0_29] : memref<16x4xf32, #tpu.memory_space<vmem>>, vector<16x4xf32>
    %c0_30 = arith.constant 0 : index
    %c0_31 = arith.constant 0 : index
    %c0_32 = arith.constant 0 : index
    %25 = vector.load %arg1[%c0_30, %c0_31, %c0_32] : memref<4x16x16xf32, #tpu.memory_space<vmem>>, vector<1x16x16xf32>
    %26 = vector.shape_cast %25 : vector<1x16x16xf32> to vector<16x16xf32>
    %cst_33 = arith.constant dense<0.000000e+00> : vector<16x4xf32>
    %27 = tpu.matmul %26, %24, %cst_33 {dimension_numbers = #tpu.dot_dimension_numbers<[1], [0], [0], [1], [0, 0, 1, 1], [], []>} : vector<16x16xf32>, vector<16x4xf32>, vector<16x4xf32> -> vector<16x4xf32>
    %c0_34 = arith.constant 0 : index
    %c0_35 = arith.constant 0 : index
    %28 = vector.load %arg9[%c0_34, %c0_35] : memref<16x16xf32, #tpu.memory_space<vmem>>, vector<16x4xf32>
    tpu.vector_store %arg9[%c0_34, %c0_35], %27 {strides = array<i32>} : memref<16x16xf32, #tpu.memory_space<vmem>>, vector<16x4xf32>,
    %c1_36 = arith.constant 1 : index
    %c0_37 = arith.constant 0 : index
    %c0_38 = arith.constant 0 : index
    %29 = vector.load %arg1[%c1_36, %c0_37, %c0_38] : memref<4x16x16xf32, #tpu.memory_space<vmem>>, vector<1x16x16xf32>
    %30 = vector.shape_cast %29 : vector<1x16x16xf32> to vector<16x16xf32>
    %cst_39 = arith.constant dense<0.000000e+00> : vector<16x4xf32>
    %31 = tpu.matmul %30, %24, %cst_39 {dimension_numbers = #tpu.dot_dimension_numbers<[1], [0], [0], [1], [0, 0, 1, 1], [], []>} : vector<16x16xf32>, vector<16x4xf32>, vector<16x4xf32> -> vector<16x4xf32>
    %c0_40 = arith.constant 0 : index
    %c4 = arith.constant 4 : index
    %32 = vector.load %arg9[%c0_40, %c4] : memref<16x16xf32, #tpu.memory_space<vmem>>, vector<16x4xf32>
    tpu.vector_store %arg9[%c0_40, %c4], %31 {strides = array<i32>} : memref<16x16xf32, #tpu.memory_space<vmem>>, vector<16x4xf32>,
    %c2_41 = arith.constant 2 : index
    %c0_42 = arith.constant 0 : index
    %c0_43 = arith.constant 0 : index
    %33 = vector.load %arg1[%c2_41, %c0_42, %c0_43] : memref<4x16x16xf32, #tpu.memory_space<vmem>>, vector<1x16x16xf32>
    %34 = vector.shape_cast %33 : vector<1x16x16xf32> to vector<16x16xf32>
    %cst_44 = arith.constant dense<0.000000e+00> : vector<16x4xf32>
    %35 = tpu.matmul %34, %24, %cst_44 {dimension_numbers = #tpu.dot_dimension_numbers<[1], [0], [0], [1], [0, 0, 1, 1], [], []>} : vector<16x16xf32>, vector<16x4xf32>, vector<16x4xf32> -> vector<16x4xf32>
    %c0_45 = arith.constant 0 : index
    %c8_46 = arith.constant 8 : index
    %36 = vector.load %arg9[%c0_45, %c8_46] : memref<16x16xf32, #tpu.memory_space<vmem>>, vector<16x4xf32>
    tpu.vector_store %arg9[%c0_45, %c8_46], %35 {strides = array<i32>} : memref<16x16xf32, #tpu.memory_space<vmem>>, vector<16x4xf32>,
    %c3_47 = arith.constant 3 : index
    %c0_48 = arith.constant 0 : index
    %c0_49 = arith.constant 0 : index
    %37 = vector.load %arg1[%c3_47, %c0_48, %c0_49] : memref<4x16x16xf32, #tpu.memory_space<vmem>>, vector<1x16x16xf32>
    %38 = vector.shape_cast %37 : vector<1x16x16xf32> to vector<16x16xf32>
    %cst_50 = arith.constant dense<0.000000e+00> : vector<16x4xf32>
    %39 = tpu.matmul %38, %24, %cst_50 {dimension_numbers = #tpu.dot_dimension_numbers<[1], [0], [0], [1], [0, 0, 1, 1], [], []>} : vector<16x16xf32>, vector<16x4xf32>, vector<16x4xf32> -> vector<16x4xf32>
    %c0_51 = arith.constant 0 : index
    %c12 = arith.constant 12 : index
    %40 = vector.load %arg9[%c0_51, %c12] : memref<16x16xf32, #tpu.memory_space<vmem>>, vector<16x4xf32>
    tpu.vector_store %arg9[%c0_51, %c12], %39 {strides = array<i32>} : memref<16x16xf32, #tpu.memory_space<vmem>>, vector<16x4xf32>,
    %c0_52 = arith.constant 0 : index
    %c0_53 = arith.constant 0 : index
    %41 = vector.load %arg9[%c0_52, %c0_53] : memref<16x16xf32, #tpu.memory_space<vmem>>, vector<16x16xf32>
    %cst_54 = arith.constant dense<0.000000e+00> : vector<4x16xf32>
    %42 = tpu.matmul %23, %41, %cst_54 {dimension_numbers = #tpu.dot_dimension_numbers<[1], [0], [0], [1], [0, 0, 1, 1], [], []>} : vector<4x16xf32>, vector<16x16xf32>, vector<4x16xf32> -> vector<4x16xf32>
    %c0_55 = arith.constant 0 : index
    %c0_56 = arith.constant 0 : index
    %c0_57 = arith.constant 0 : index
    %43 = vector.load %arg7[%c0_55, %c0_56, %c0_57] : memref<1x4x16xf32, #tpu.memory_space<vmem>>, vector<1x4x16xf32>
    %44 = vector.shape_cast %43 : vector<1x4x16xf32> to vector<4x16xf32>
    %45 = vector.shape_cast %42 : vector<4x16xf32> to vector<1x4x16xf32>
    tpu.vector_store %arg7[%c0_55, %c0_56, %c0_57], %45 {strides = array<i32>} : memref<1x4x16xf32, #tpu.memory_space<vmem>>, vector<1x4x16xf32>,
    return
  }
  func.func @transform_0(%arg0: i32) -> (i32, i32, i32) {
    %c0_i32 = arith.constant 0 : i32
    %c0_i32_0 = arith.constant 0 : i32
    %c0_i32_1 = arith.constant 0 : i32
    return %arg0, %c0_i32, %c0_i32_0 : i32, i32, i32
  }
  func.func @transform_1(%arg0: i32) -> (i32, i32) {
    %c0_i32 = arith.constant 0 : i32
    %c0_i32_0 = arith.constant 0 : i32
    %c0_i32_1 = arith.constant 0 : i32
    return %c0_i32, %c0_i32_0 : i32, i32
  }
  func.func @transform_2(%arg0: i32) -> (i32, i32) {
    %c0_i32 = arith.constant 0 : i32
    %c0_i32_0 = arith.constant 0 : i32
    %c0_i32_1 = arith.constant 0 : i32
    return %c0_i32, %c0_i32_0 : i32, i32
  }
  func.func @transform_3(%arg0: i32) -> (i32, i32) {
    %c0_i32 = arith.constant 0 : i32
    %c0_i32_0 = arith.constant 0 : i32
    %c0_i32_1 = arith.constant 0 : i32
    return %c0_i32, %c0_i32_0 : i32, i32
  }
  func.func @transform_4(%arg0: i32) -> (i32, i32) {
    %c0_i32 = arith.constant 0 : i32
    %c0_i32_0 = arith.constant 0 : i32
    %c0_i32_1 = arith.constant 0 : i32
    return %c0_i32, %c0_i32_0 : i32, i32
  }
  func.func @transform_5(%arg0: i32) -> (i32, i32, i32) {
    %c0_i32 = arith.constant 0 : i32
    %c0_i32_0 = arith.constant 0 : i32
    %c0_i32_1 = arith.constant 0 : i32
    return %arg0, %c0_i32, %c0_i32_0 : i32, i32, i32
  }
  func.func @transform_6(%arg0: i32) -> (i32, i32, i32) {
    %c0_i32 = arith.constant 0 : i32
    %c0_i32_0 = arith.constant 0 : i32
    %c0_i32_1 = arith.constant 0 : i32
    return %arg0, %c0_i32, %c0_i32_0 : i32, i32, i32
  }
}

</mosaic_0001>

<bundles_post_ra>
// kernel: tpu_custom_call.1
= control target key start
LH: loop header
LB: loop body
LE: loop exit
PB: predicated region body
PF: predicated region fallthrough
CT: control target
= control target key end

     0   :  { %12 = vsyncpa [#allocation5], 0  ;;  %s1997_s0 = inlined_call_operand.hbm [shape: f32[8,16,16], index: 0, kind: input, shape index: {}]   ;;  %s1998_s1 = inlined_call_operand.vmem [shape: f32[8,16], index: 1, kind: input, shape index: {}]   ;;  %s1999_s2 = inlined_call_operand.vmem [shape: f32[16,8], index: 2, kind: input, shape index: {}]   ;;  %s2000_s3 = inlined_call_operand.vmem [shape: f32[4,16], index: 3, kind: input, shape index: {}]   ;;  %s2001_s4 = inlined_call_operand.vmem [shape: f32[16,4], index: 4, kind: input, shape index: {}]   ;;  %s2002_s5 = inlined_call_operand.hbm [shape: f32[2,8,32], index: 5, kind: output, shape index: {0}]   ;;  %s2003_s6 = inlined_call_operand.hbm [shape: f32[2,4,16], index: 6, kind: output, shape index: {1}]  }
   0x1   :  { %14 = vsyncpa [#allocation5 + $0x1], 0 }
   0x2   :  { %15 = vsyncpa [#allocation6], 0 }
   0x3   :  { %17 = vsyncpa [#allocation6 + $0x1], 0 }
   0x4   :  { %18 = vsyncpa [#allocation9], 0 }
   0x5   :  { %20 = vsyncpa [#allocation9 + $0x1], 0  ;;  %s1751_s21 = smov 0   ;;  %s1753_s22 = smov 0  }
   0x6   :  { %s1755_s23 = smov 0   ;;  %s1757_s24 = smov 0  }
   0x7 LB: > { %s1772_s25 = sadd.s32 4294967295, %s1701_s24   ;;  %s1317_s26 = sadd.s32 4294967294, %s1701_s24   ;;  %s1701_s24 = sphi %s1757_s24, %s2016_s24   ;;  %s1697_s23 = sphi %s1755_s23, %s2015_s23   ;;  %s1693_s22 = sphi %s1753_s22, %s2014_s22   ;;  %s1689_s21 = sphi %s1751_s21, %s2013_s21  }
   0x8   : > { %s1776_s27 = sadd.s32 1, %s1701_s24   ;;  %s33_s28 = sadd.s32 1, %s1697_s23 }
   0x9   : > { %s30_s29 = ssub.s32 %s1701_s24, %s1776_s27  ;;  %p40_p0 = scmp.ne.s32.totalorder %s1697_s23, %s1693_s22 }
   0xa   : > { %p31_p1 = scmp.eq.s32.totalorder %s30_s29, 0  ;;  %p41_p2 = scmp.eq.s32.totalorder %s1701_s24, 0 }
   0xb   : > { %p46_p3 = scmp.ne.s32.totalorder %s1693_s22, %s1689_s21  ;;  %p47_p4 = scmp.eq.s32.totalorder %s1772_s25, 0 }
   0xc   : > { %s1788_s30 = scalar_select %p31_p1, %s1697_s23, %s33_s28  }
   0xd   : > { %p1790_p5 = por %p41_p2, %p40_p0  ;;  %p1794_p6 = por %p47_p4, %p46_p3 }
   0xe   : > { %p154_p7 = scmp.eq.s32.totalorder %s1772_s25, 1  ;;  %p160_p8 = scmp.eq.s32.totalorder %s1317_s26, 1 }
   0xf   : > { %p1529_p10 = scmp.lt.s32.totalorder %s1701_s24, 2  ;;  %s218_s11 = sand.u32 1, %s1697_s23  }
  0x10   : > { %p1801_p11 = por %p154_p7, %p40_p0  ;;  %p1805_p12 = por %p160_p8, %p46_p3 }
  0x11   : > { %s1365_s12 = sshll.u32 %s1701_s24, 10  ;;  %s1320_s13 = sshll.u32 %s218_s11, 6 }
  0x12   : > { %s2007_s9 = scalar_select %p1801_p11, 1, 0 }
  0x13   : > { %s2008_s10 = scalar_select %p1805_p12, 1, 0 }
  0x14   : > { %s1814_s16 = scalar_lea.hbm %s1997_s0, %s1365_s12  ;;  %s222_s17 = scalar_lea.vmem [#allocation4], %s1320_s13 }
  0x15   : > { %s230_s18 = sshll.u32 %s222_s17, 4  ;;  %p1818_p13 = pnand %p1529_p10, %p1790_p5  ;;  %s1822_s18 = int_to_ptr.vmem [resolvable:$true] %s230_s18 }
  0x16   : > { %s1824_s20 = scalar_lea.sflag [#allocation5], %s218_s11  ;;  %s1573_s26 = scalar_lea.hbm %s1814_s16, 1024 }
  0x17   : > { %p1574_p0 = scmp.ne.s32.totalorder %s1814_s16, %s1573_s26  ;;  %p1575_p1 = pneg %p1818_p13 }
  0x18   : > { %s1578_s7 = scalar_lea.hbm %s1997_s0, 2048  ;;  %p1579_p4 = scmp.lt.u32.totalorder %s1814_s16, %s1997_s0 }
  0x19   : > { %p1576_p2 = pnand %p1575_p1, %p1574_p0  ;;  %p1580_p5 = scmp.lt.u32.totalorder %s1578_s7, %s1573_s26 }
  0x1a   : > { %p1582_p8 = scmp.lt.u32.totalorder %s1573_s26, %s1814_s16 }
  0x1b   : > { %p1577_p3 = pneg %p1576_p2  ;;  %p1581_p7 = por %p1580_p5, %p1579_p4 }
  0x1d   : > { %p1583_p10 = por %p1582_p8, %p1581_p7 }
  0x1f   : > { %p1584_p9 = pnand %p1583_p10, %p1577_p3 }
  0x21   : > { %1587 = shalt.err (!%p1584_p9)
}
  0x22   : > { %s1588_s11 = scalar_lea.vmem %s1822_s18, 1024  ;;  %s1703_s14 = smov [#allocation4]  }
  0x23   : > { %p1589_p0 = scmp.ne.s32.totalorder %s1822_s18, %s1588_s11  ;;  %s1593_s15 = sshll.u32 %s1703_s14, 4  ;;  %s1594_s15 = int_to_ptr.vmem [resolvable:$false] %s1593_s15 }
  0x24   : > { %s1595_s17 = scalar_lea.vmem %s1594_s15, 2048  ;;  %p1596_p11 = scmp.lt.s32.totalorder %s1822_s18, %s1594_s15 }
  0x25   : > { %p1591_p2 = pnand %p1589_p0, %p1575_p1  ;;  %p1597_p4 = scmp.lt.s32.totalorder %s1595_s17, %s1588_s11 }
  0x27   : > { %p1592_p12 = pneg %p1591_p2  ;;  %p1598_p5 = por %p1597_p4, %p1596_p11 }
  0x29   : > { %p1599_p7 = pnand %p1598_p5, %p1592_p12 }
  0x2b   : > { %1602 = shalt.err (!%p1599_p7)
}
  0x2c   : > { %s1704_s26 = smov 128   ;;  %s1705_s28 = smov 8  }
  0x2d   : > { %1521 = dma.hbm_to_vmem [thread:$0]  (!%p1818_p13), %s1814_s16, 1024, %s1822_s18, %s1824_s20, %s1704_s26, %s1704_s26, %s1705_s28  }
  0x2e   : > { %p1324_p9 = scmp.ge.s32.totalorder %s1701_s24, 1  ;;  %p238_p1 = scmp.lt.s32.totalorder %s1701_s24, 3 }
  0x30   : > { %p239_p3 = pnand %p1324_p9, %p238_p1 }
  0x31   : > { %s1855_s29 = sand.u32 (!%p239_p3), 1, %s1693_s22  }
  0x32   : > { %242 = sbr.rel (%p239_p3) target bundleno = 992 (0x3e0), region = 40  ;;  %s1325_s7 = sshll.u32 (!%p239_p3), %s1855_s29, 6 }
  0x33   : > { %s245_s12 = scalar_lea.sflag (!%p239_p3), [#allocation5], %s1855_s29  ;;  %s248_s13 = scalar_lea.vmem (!%p239_p3), [#allocation4], %s1325_s7 }
  0x39   : > { %1676 = dma.done.wait (%p1794_p6), %s245_s12, 1024  }
  0x3a   : > { %1678 = vsyncadd (%p1794_p6), %s245_s12, 4294966272  ;;  %vm288_vm0 = vcmask 130048   ;;  %v284_v0 = vld [vmem:[%s1999_s2] sm:$0xff]  ;;  %v285_v1 = vld [vmem:[%s1999_s2 + $0x8] sm:$0xff]  ;;  %vm370_vm1 = vcmask 64512   ;;  %s1706_s17 = smov 8  }
  0x3b   : > { %v286_v2 = vld [vmem:[%s248_s13] sm:$0xff]  ;;  %v1474_v3 = vpack.c.bf16 %v285_v1, %v284_v0  ;;  %v1870_v4 = vld [vmem:[%s248_s13 + $0x10] sm:$0xff]  ;;  %v287_v5 = vld [vmem:[%s248_s13 + $0x8] sm:$0xff]  ;;  %v1707_v18 = vmov 0.0|0.0   ;;  %s1708_s26 = smov 16   ;;  %s1709_s28 = smov 24  }
  0x3c   : > { %1408 = vmatprep.mubr.msk.f32.mxu0 %vm288_vm0, %v286_v2  ;;  %1415 = vmatprep.mubr.msk.f32.mxu1 %vm288_vm0, %v1870_v4  ;;  %v1874_v6 = vld [vmem:[%s248_s13 + $0x18] sm:$0xff]  ;;  %v1334_v7 = vld [vmem:[%s248_s13 + $0x20] sm:$0xff]  ;;  %v1876_v8 = vld [vmem:[%s248_s13 + $0x30] sm:$0xff]  ;;  %vm1710_vm2 = vmmov 0   ;;  %v1711_v23 = vmov 0.0   ;;  %vm465_vm3 = vcmask 130112  }
  0x3d   : > { %1475 = vmatprep.subr.bf16.mxu0 %v1474_v3  ;;  %1479 = vmatprep.subr.bf16.mxu1 %v1474_v3  ;;  %v1335_v9 = vld [vmem:[%s248_s13 + $0x28] sm:$0xff]  ;;  %v1884_v10 = vld [vmem:[%s248_s13 + $0x38] sm:$0xff]  ;;  %v736_v13 = vld [vmem:[%s2001_s4] sm:$0xff]  ;;  %vm560_vm4 = vcmask 195712   ;;  %vm655_vm5 = vcmask 261312   ;;  %vm821_vm6 = vcmask 31744  }
  0x3e   : > { %1477 = vmatpush3.bf16.msra.mxu0 %v1474_v3  ;;  %1481 = vmatpush3.bf16.msra.mxu1 %v1474_v3  ;;  %v737_v14 = vld [vmem:[%s2001_s4 + $0x8] sm:$0xff]  ;;  %v283_v33 = vld [vmem:[%s1998_s1] sm:$0xff]  ;;  %s1326_s13 = sshll.u32 %s1855_s29, 3  ;;  %vm733_vm7 = vcmask 261120   ;;  %s1712_s18 = smov 4   ;;  %vm915_vm8 = vcmask 64544  }
  0x3f   : > { %1483 = vmatprep.subr.bf16.mxu0 %v1474_v3  ;;  %1487 = vmatprep.subr.bf16.mxu1 %v1474_v3  ;;  %v1493_v17 = vpack.c.bf16 %v737_v14, %v736_v13  ;;  %s1916_s16 = scalar_lea.vmem [#allocation7], %s1326_s13  ;;  %s1713_s19 = smov 12   ;;  %vm1009_vm9 = vcmask 97344   ;;  %vm1103_vm10 = vcmask 130144   ;;  %v735_v53 = vld [vmem:[%s2000_s3] sm:$0xf] }
  0x40   : > { %s1360_s11 = sshll.u32 %s1772_s25, 7  ;;  %s1202_s14 = sshll.u32 %s1916_s16, 4  ;;  %s1203_s14 = int_to_ptr.vmem [resolvable:$true] %s1202_s14 }
  0x41   : > { %1409 = vmatmul.mubr.msk.f32.vlgmr.msra.gmra.mrb[0].mxu0 %vm288_vm0, %v287_v5  ;;  %1416 = vmatmul.mubr.msk.f32.vlgmr.msra.gmra.mrb[0].mxu1 %vm288_vm0, %v1874_v6  ;;  %s1603_s7 = scalar_lea.vmem %s1203_s14, 128  ;;  %p2010_p11 = scmp.ne.s32.totalorder %s2007_s9, 0 }
  0x42   : > { %1485 = vmatpush3.bf16.msra.mxu0 %v1474_v3  ;;  %1422 = vmatprep.mubr.msk.f32.mxu0 %vm288_vm0, %v1334_v7  ;;  %p1604_p6 = scmp.ne.s32.totalorder %s1203_s14, %s1603_s7  ;;  %s1714_s12 = smov [#allocation7]  }
  0x43   : > { %1489 = vmatpush3.bf16.msra.mxu1 %v1474_v3  ;;  %1429 = vmatprep.mubr.msk.f32.mxu1 %vm288_vm0, %v1876_v8  ;;  %s1607_s13 = sshll.u32 %s1714_s12, 4  ;;  %s1608_s13 = int_to_ptr.vmem [resolvable:$false] %s1607_s13 }
  0x44   : > { %1490 = vmatprep.subr.bf16.mxu0 %v1707_v18  ;;  %1494 = vmatprep.subr.bf16.mxu1 %v1493_v17  ;;  %p1605_p12 = pnand %p1604_p6, %p2010_p11  ;;  %p1610_p8 = scmp.lt.s32.totalorder %s1203_s14, %s1608_s13 }
  0x45   : > { %1423 = vmatmul.mubr.msk.f32.vlgmr.msra.gmra.mrb[2].mxu0 %vm288_vm0, %v1335_v9 }
  0x46   : > { %1430 = vmatmul.mubr.msk.f32.vlgmr.msra.gmra.mrb[2].mxu1 %vm288_vm0, %v1884_v10  ;;  %1436 = vmatprep.mubr.msk.f32.mxu0 %vm1710_vm2, %v1711_v23  ;;  %p1606_p13 = pneg %p1605_p12 }
  0x47   : > { %1443 = vmatprep.mubr.msk.f32.mxu1 %vm288_vm0, %v286_v2  ;;  %1496 = vmatpush3.bf16.msra.mxu1 %v1493_v17 }
  0x48   : > { %1502 = vmatprep.subr.bf16.mxu1 %v1493_v17 }
  0x4a   : > { %1444 = vmatmul.mubr.msk.f32.vlgmr.msra.gmra.mrb[4].mxu1 %vm288_vm0, %v287_v5 }
  0x4b   : > { %1504 = vmatpush3.bf16.msra.mxu1 %v1493_v17  ;;  %1457 = vmatprep.mubr.msk.f32.mxu1 %vm288_vm0, %v1334_v7 }
  0x4c   : > { %1509 = vmatprep.subr.bf16.mxu1 %v1707_v18 }
  0x4e   : > { %1458 = vmatmul.mubr.msk.f32.vlgmr.msra.gmra.mrb[6].mxu1 %vm288_vm0, %v1335_v9 }
  0x4f   : > { %1471 = vmatprep.mubr.msk.f32.mxu1 %vm1710_vm2, %v1711_v23 }
 0x114   : > { %v1410_v11 = vpop.f32.mrb[0].mxu0  ;;  %v1417_v12 = vpop.f32.mrb[0].mxu1 }
 0x115   : > { %372 = vst.msk [vmem:[#allocation2 + $0x8] sm:$0xff] %vm370_vm1, %v1410_v11  ;;  %461 = vrot.lane.b32.xlu0 %v1417_v12, %s1706_s17  ;;  %v361_v15 = vpop.f32.mrb[1].mxu0  ;;  %v448_v16 = vpop.f32.mrb[1].mxu1 }
 0x116   : > { %371 = vst.msk [vmem:[#allocation2] sm:$0xff] %vm370_vm1, %v361_v15 }
 0x118   : > { %v1424_v19 = vpop.f32.mrb[2].mxu0 }
 0x119   : > { %459 = vrot.lane.b32.xlu0 %v448_v16, %s1706_s17  ;;  %556 = vrot.lane.b32.xlu1 %v1424_v19, %s1708_s26  ;;  %v543_v20 = vpop.f32.mrb[3].mxu0  ;;  %v1431_v21 = vpop.f32.mrb[2].mxu1 }
 0x11a   : > { %v638_v22 = vpop.f32.mrb[3].mxu1 }
 0x11d   : > { %554 = vrot.lane.b32.xlu1 %v543_v20, %s1708_s26  ;;  %649 = vrot.lane.b32.xlu0 %v638_v22, %s1709_s28  ;;  %v1445_v34 = vpop.f32.mrb[4].mxu1  ;;  %s1928_s26 = scalar_lea.hbm %s2002_s5, %s1360_s11 }
 0x11e   : > { %823 = vst.msk [vmem:[#allocation3 + $0x8] sm:$0xff] %vm821_vm6, %v1445_v34  ;;  %v812_v35 = vpop.f32.mrb[5].mxu1 }
 0x11f   : > { %822 = vst.msk [vmem:[#allocation3] sm:$0xff] %vm821_vm6, %v812_v35 }
 0x121   : > { %651 = vrot.lane.b32.xlu1 %v1431_v21, %s1709_s28  ;;  %v1459_v36 = vpop.f32.mrb[6].mxu1  ;;  %s1184_s28 = scalar_lea.sflag [#allocation6], %s1855_s29 }
 0x122   : > { %v992_v37 = vpop.f32.mrb[7].mxu1 }
 0x123   : > { %1003 = vrot.lane.b32.xlu0 %v992_v37, %s1706_s17 }
 0x125   : > { %1005 = vrot.lane.b32.xlu1 %v1459_v36, %s1706_s17 }
 0x187   : > { %v462_v24 = vpop.permute.xlu0 %461 }
 0x188   : > { %467 = vst.msk [vmem:[#allocation2 + $0x8] sm:$0xff] %vm465_vm3, %v462_v24 }
 0x18b   : > { %v460_v25 = vpop.permute.xlu0 %459  ;;  %v557_v26 = vpop.permute.xlu1 %556 }
 0x18c   : > { %466 = vst.msk [vmem:[#allocation2] sm:$0xff] %vm465_vm3, %v460_v25 }
 0x18d   : > { %562 = vst.msk [vmem:[#allocation2 + $0x8] sm:$0xff] %vm560_vm4, %v557_v26 }
 0x18f   : > { %v555_v27 = vpop.permute.xlu1 %554  ;;  %v650_v28 = vpop.permute.xlu0 %649 }
 0x190   : > { %561 = vst.msk [vmem:[#allocation2] sm:$0xff] %vm560_vm4, %v555_v27 }
 0x191   : > { %656 = vst.msk [vmem:[#allocation2] sm:$0xff] %vm655_vm5, %v650_v28 }
 0x193   : > { %v652_v29 = vpop.permute.xlu1 %651 }
 0x194   : > { %657 = vst.msk [vmem:[#allocation2 + $0x8] sm:$0xff] %vm655_vm5, %v652_v29 }
 0x195   : > { %v1004_v45 = vpop.permute.xlu0 %1003 }
 0x197   : > { %v1006_v44 = vpop.permute.xlu1 %1005 }
 0x198   : > { %v658_v30 = vld [vmem:[#allocation2] sm:$0xff] }
 0x19b   : > { %v659_v31 = vld [vmem:[#allocation2 + $0x8] sm:$0xff] }
 0x19c   : > { %v1491_v32 = vpack.c.bf16 %v659_v31, %v658_v30 }
 0x19e   : > { %1492 = vmatpush3.bf16.msra.mxu0 %v1491_v32 }
 0x19f   : > { %1498 = vmatprep.subr.bf16.mxu0 %v1493_v17 }
 0x1a1   : > { %1437 = vmatmul.mubr.msk.f32.vlgmr.msra.gmra.mrb[4].mxu0 %vm288_vm0, %v283_v33 }
 0x1a2   : > { %1500 = vmatpush3.bf16.msra.mxu0 %v1493_v17  ;;  %1450 = vmatprep.mubr.msk.f32.mxu0 %vm288_vm0, %v1870_v4 }
 0x1a3   : > { %1506 = vmatprep.subr.bf16.mxu0 %v1493_v17 }
 0x1a5   : > { %1451 = vmatmul.mubr.msk.f32.vlgmr.msra.gmra.mrb[6].mxu0 %vm288_vm0, %v1874_v6 }
 0x1a6   : > { %1508 = vmatpush3.bf16.msra.mxu0 %v1493_v17  ;;  %1464 = vmatprep.mubr.msk.f32.mxu0 %vm288_vm0, %v1876_v8 }
 0x1a9   : > { %1465 = vmatmul.mubr.msk.f32.vlgmr.msra.gmra.mrb[8].mxu0 %vm288_vm0, %v1884_v10 }
 0x274   : > { %v729_v38 = vpop.f32.mrb[4].mxu0 }
 0x275   : > { %734 = vst.msk [vmem:[%s1916_s16] sm:$0xff] %vm733_vm7, %v729_v38  ;;  %v1438_v39 = vpop.f32.mrb[5].mxu0 }
 0x278   : > { %v1452_v40 = vpop.f32.mrb[6].mxu0 }
 0x279   : > { %911 = vrot.lane.b32.xlu1 %v1452_v40, %s1712_s18  ;;  %v898_v41 = vpop.f32.mrb[7].mxu0 }
 0x27a   : > { %909 = vrot.lane.b32.xlu0 %v898_v41, %s1712_s18  ;;  %s1609_s18 = scalar_lea.vmem %s1608_s13, 256 }
 0x27b   : > { %p1611_p10 = scmp.lt.s32.totalorder %s1609_s18, %s1603_s7 }
 0x27c   : > { %v1466_v42 = vpop.f32.mrb[8].mxu0 }
 0x27d   : > { %1099 = vrot.lane.b32.xlu1 %v1466_v42, %s1713_s19  ;;  %v1086_v43 = vpop.f32.mrb[9].mxu0  ;;  %p1612_p0 = por %p1611_p10, %p1610_p8 }
 0x27e   : > { %1097 = vrot.lane.b32.xlu0 %v1086_v43, %s1713_s19 }
 0x27f   : > { %p1613_p2 = pnand %p1612_p0, %p1606_p13 }
 0x2eb   : > { %v912_v46 = vpop.permute.xlu1 %911 }
 0x2ec   : > { %917 = vst.msk [vmem:[#allocation3 + $0x8] sm:$0xff] %vm915_vm8, %v912_v46  ;;  %v910_v47 = vpop.permute.xlu0 %909 }
 0x2ed   : > { %916 = vst.msk [vmem:[#allocation3] sm:$0xff] %vm915_vm8, %v910_v47 }
 0x2ee   : > { %1011 = vst.msk [vmem:[#allocation3 + $0x8] sm:$0xff] %vm1009_vm9, %v1006_v44  ;;  %1010 = vst.msk [vmem:[#allocation3] sm:$0xff] %vm1009_vm9, %v1004_v45 }
 0x2ef   : > { %v1100_v48 = vpop.permute.xlu1 %1099 }
 0x2f0   : > { %1105 = vst.msk [vmem:[#allocation3 + $0x8] sm:$0xff] %vm1103_vm10, %v1100_v48  ;;  %v1098_v49 = vpop.permute.xlu0 %1097 }
 0x2f1   : > { %1104 = vst.msk [vmem:[#allocation3] sm:$0xff] %vm1103_vm10, %v1098_v49 }
 0x2f7   : > { %v1107_v50 = vld [vmem:[#allocation3 + $0x8] sm:$0xff] }
 0x2f8   : > { %v1106_v51 = vld [vmem:[#allocation3] sm:$0xff] }
 0x2f9   : > { %v1510_v52 = vpack.c.bf16 %v1107_v50, %v1106_v51 }
 0x2fb   : > { %1511 = vmatpush3.bf16.msra.mxu1 %v1510_v52 }
 0x2fe   : > { %1472 = vmatmul.mubr.msk.f32.vlgmr.msra.gmra.mrb[8].mxu1 %vm288_vm0, %v735_v53 }
 0x2ff   : > { %1616 = shalt.err (!%p1613_p2)
}
 0x300   : > { %s1617_s16 = scalar_lea.hbm %s1928_s26, 128  ;;  %s1621_s8 = scalar_lea.hbm %s2002_s5, 256 }
 0x301   : > { %p1618_p4 = scmp.ne.s32.totalorder %s1928_s26, %s1617_s16  ;;  %p1622_p9 = scmp.lt.u32.totalorder %s1928_s26, %s2002_s5 }
 0x302   : > { %p1623_p1 = scmp.lt.u32.totalorder %s1621_s8, %s1617_s16  ;;  %p1625_p6 = scmp.lt.u32.totalorder %s1617_s16, %s1928_s26 }
 0x303   : > { %p1619_p5 = pnand %p1618_p4, %p2010_p11 }
 0x304   : > { %p1624_p3 = por %p1623_p1, %p1622_p9 }
 0x305   : > { %p1620_p7 = pneg %p1619_p5 }
 0x306   : > { %p1626_p12 = por %p1625_p6, %p1624_p3 }
 0x308   : > { %p1627_p13 = pnand %p1626_p12, %p1620_p7 }
 0x30a   : > { %1630 = shalt.err (!%p1627_p13)
}
 0x30b   : > { %1514 = dma.vmem_to_hbm [thread:$0]  (%p2010_p11), %s1203_s14, 128, %s1928_s26, %s1184_s28   ;;  %vm1181_vm11 = vcmask 125952  }
 0x30c   : > { %s1327_s17 = sshll.u32 %s1855_s29, 2  ;;  %s1361_s7 = sshll.u32 %s1772_s25, 6 }
 0x30d   : > { %s281_s12 = scalar_lea.vmem [#allocation8], %s1327_s17  ;;  %s1953_s16 = scalar_lea.hbm %s2003_s6, %s1361_s7 }
 0x30e   : > { %s1215_s13 = sshll.u32 %s281_s12, 4  ;;  %s1189_s20 = scalar_lea.sflag [#allocation9], %s1855_s29  ;;  %s1955_s13 = int_to_ptr.vmem [resolvable:$true] %s1215_s13 }
 0x30f   : > { %s1631_s14 = scalar_lea.vmem %s1955_s13, 64  ;;  %s1715_s25 = smov [#allocation8]  }
 0x310   : > { %p1632_p8 = scmp.ne.s32.totalorder %s1955_s13, %s1631_s14  ;;  %s1635_s26 = sshll.u32 %s1715_s25, 4  ;;  %s1636_s26 = int_to_ptr.vmem [resolvable:$false] %s1635_s26 }
 0x311   : > { %s1637_s28 = scalar_lea.vmem %s1636_s26, 128  ;;  %p1638_p2 = scmp.lt.s32.totalorder %s1955_s13, %s1636_s26 }
 0x312   : > { %p1633_p10 = pnand %p1632_p8, %p2010_p11  ;;  %p1639_p4 = scmp.lt.s32.totalorder %s1637_s28, %s1631_s14 }
 0x314   : > { %p1634_p0 = pneg %p1633_p10  ;;  %p1640_p5 = por %p1639_p4, %p1638_p2 }
 0x316   : > { %p1641_p7 = pnand %p1640_p5, %p1634_p0 }
 0x3d1   : > { %v1177_v54 = vpop.f32.mrb[8].mxu1 }
 0x3d2   : > { %1182 = vst.msk [vmem:[%s281_s12] sm:$0xf] %vm1181_vm11, %v1177_v54  ;;  %v1473_v55 = vpop.f32.mrb[9].mxu1 }
 0x3d3   : > { %1644 = shalt.err (!%p1641_p7)
}
 0x3d4   : > { %s1645_s29 = scalar_lea.hbm %s1953_s16, 64  ;;  %s1649_s15 = scalar_lea.hbm %s2003_s6, 128 }
 0x3d5   : > { %p1646_p9 = scmp.ne.s32.totalorder %s1953_s16, %s1645_s29  ;;  %p1650_p6 = scmp.lt.u32.totalorder %s1953_s16, %s2003_s6 }
 0x3d6   : > { %p1651_p12 = scmp.lt.u32.totalorder %s1649_s15, %s1645_s29  ;;  %p1653_p8 = scmp.lt.u32.totalorder %s1645_s29, %s1953_s16 }
 0x3d7   : > { %p1647_p1 = pnand %p1646_p9, %p2010_p11 }
 0x3d8   : > { %p1652_p13 = por %p1651_p12, %p1650_p6 }
 0x3d9   : > { %p1648_p3 = pneg %p1647_p1 }
 0x3da   : > { %p1654_p10 = por %p1653_p8, %p1652_p13 }
 0x3dc   : > { %p1655_p0 = pnand %p1654_p10, %p1648_p3 }
 0x3de   : > { %1658 = shalt.err (!%p1655_p0)
}
 0x3df   : > { %1515 = dma.vmem_to_hbm [thread:$0]  (%p2010_p11), %s1955_s13, 64, %s1953_s16, %s1189_s20  }
 0x3e0 PF: > { %s1227_s12 = sand.u32 1, %s1689_s21   ;;  %p2011_p2 = scmp.ne.s32.totalorder %s2008_s10, 0 }
 0x3e1   : > { %p2012_p4 = scmp.ge.s32.totalorder %s1701_s24, 2  ;;  %s1228_s18 = scalar_lea.sflag [#allocation6], %s1227_s12 }
 0x3e3   : > { %p1523_p5 = pnand %p2012_p4, %p2011_p2 }
 0x3e5   : > { %1680 = dma.done.wait (!%p1523_p5), %s1228_s18, 128  }
 0x3e6   : > { %1682 = vsyncadd (!%p1523_p5), %s1228_s18, 4294967168  ;;  %s1237_s19 = scalar_lea.sflag [#allocation9], %s1227_s12 }
 0x3e7   : > { %1684 = dma.done.wait (!%p1523_p5), %s1237_s19, 64  }
 0x3e8   : > { %1686 = vsyncadd (!%p1523_p5), %s1237_s19, 4294967232  ;;  %p23_p11 = scmp.ge.s32.totalorder %s1776_s27, 4   ;;  %s2013_s21 = smov %s1693_s22 }
 0x3e9   : > { %s2014_s22 = smov %s1697_s23  ;;  %s2015_s23 = smov %s1788_s30 }
 0x3ea   : > { %s2016_s24 = smov %s1776_s27  ;;  %25 = sbr.rel (!%p23_p11) target bundleno = 7 (0x7), region = 105 }
 0x3f1   :  { %1242 = vsyncpa [#allocation5], 1 }
 0x3f2   :  { %1244 = vsyncpa [#allocation5 + $0x1], 1 }
 0x3f3   :  { %1245 = vsyncpa [#allocation6], 1 }
 0x3f4   :  { %1247 = vsyncpa [#allocation6 + $0x1], 1 }
 0x3f5   :  { %1248 = vsyncpa [#allocation9], 1 }
 0x3f6   :  { %1250 = vsyncpa [#allocation9 + $0x1], 1 }

</bundles_post_ra>
